<compile_context>
chip_gen: v7x
topology: tpu7x:2x2x1
jax: 0.10.0
libtpu: 0.0.40
codegen_flags: <defaults>
</compile_context>

<pallas_src>
import jax
import jax.numpy as jnp
import numpy as np
from jax.experimental import pallas as pl
from jax.experimental.pallas import tpu as pltpu


def _round_up(x, m):
    return (x + m - 1) // m * m


def _backbone_update_kernel(x_ref, w_ref, b_ref, mask_ref, out_ref):
    # MXU: [tm, D] @ [D, 8]  (columns 6, 7 of w are zero padding).
    x = x_ref[...].astype(jnp.float32)
    proj = jnp.dot(x, w_ref[...], preferred_element_type=jnp.float32)   # [tm, 8]

    # Lane-dense from here on: residues live on the lane axis.
    p = proj.T + b_ref[...]            # [8, tm]  (small XLU transpose + bias)
    m = mask_ref[...]                  # [1, tm]

    rb = p[0:1, :] * m                 # unnormalized quaternion imaginary parts
    rc = p[1:2, :] * m
    rd = p[2:3, :] * m
    t0 = p[3:4, :] * m                 # translation
    t1 = p[4:5, :] * m
    t2 = p[5:6, :] * m

    # 1 / sqrt(1 + |rot|^2): one EUP rsqrt, no divide; reduce is plain adds.
    inv = jax.lax.rsqrt(1.0 + rb * rb + rc * rc + rd * rd)              # [1, tm]
    a = inv
    b = rb * inv
    c = rc * inv
    d = rd * inv

    aa = a * a
    bb = b * b
    cc = c * c
    dd = d * d
    two = jnp.float32(2.0)

    # Fused lane-dense output: 9 rotation rows (row-major) + 3 translation rows.
    out = jnp.concatenate(
        [
            aa + bb - cc - dd, two * (b * c - a * d), two * (b * d + a * c),
            two * (b * c + a * d), aa - bb + cc - dd, two * (c * d - a * b),
            two * (b * d - a * c), two * (c * d + a * b), aa - bb - cc + dd,
            t0, t1, t2,
        ],
        axis=0,
    )                                                                   # [12, tm]
    out_ref[...] = out.astype(out_ref.dtype)


def backbone_update(node_features, weight, bias, update_mask=None, *, tm=1024):
    """Pallas TPU implementation of BackboneUpdate.forward.

    node_features: [N, node_dim]   (f32 or bf16; dtype preserved for the HBM read)
    weight:        [6, node_dim]   (PyTorch nn.Linear weight layout)
    bias:          [6]
    update_mask:   [N] or None
    Returns (t [N, 3], R [N, 3, 3]) in float32.
    """
    N, D = node_features.shape
    assert tm % 128 == 0, "row tile must be a multiple of 128"

    # ---- pick a large, VMEM-safe row tile ---------------------------------
    itemsize = jnp.dtype(node_features.dtype).itemsize
    vmem_budget = 8 * 1024 * 1024          # double-buffered input budget (safe on v7x)
    max_rows = max(128, (vmem_budget // (2 * D * itemsize)) // 128 * 128)
    tm_eff = min(tm, max_rows, _round_up(N, 128))
    # v7x megacore: prefer >=2 parallel grid steps when the problem allows it.
    if _round_up(N, tm_eff) // tm_eff == 1 and tm_eff % 256 == 0:
        tm_eff //= 2
    n_pad = _round_up(N, tm_eff)
    grid = (n_pad // tm_eff,)

    # ---- pad inputs (padded rows are masked / sliced off) -----------------
    x = node_features
    if n_pad != N:
        x = jnp.pad(x, ((0, n_pad - N), (0, 0)))
    if update_mask is None:
        mask = jnp.ones((1, n_pad), jnp.float32)
    else:
        mask = jnp.pad(update_mask.astype(jnp.float32), (0, n_pad - N)).reshape(1, n_pad)

    w_pad = jnp.zeros((D, 8), jnp.float32).at[:, :6].set(weight.T.astype(jnp.float32))
    b_pad = jnp.zeros((8, 1), jnp.float32).at[:6, 0].set(bias.astype(jnp.float32))

    out = pl.pallas_call(
        _backbone_update_kernel,
        out_shape=jax.ShapeDtypeStruct((12, n_pad), jnp.float32),
        grid_spec=pltpu.PrefetchScalarGridSpec(
            num_scalar_prefetch=0,
            grid=grid,
            in_specs=[
                pl.BlockSpec((tm_eff, D), lambda i: (i, 0)),   # node features tile
                pl.BlockSpec((D, 8), lambda i: (0, 0)),        # padded weight (full)
                pl.BlockSpec((8, 1), lambda i: (0, 0)),        # padded bias column
                pl.BlockSpec((1, tm_eff), lambda i: (0, i)),   # mask, lane-dense
            ],
            out_specs=pl.BlockSpec((12, tm_eff), lambda i: (0, i)),
        ),
        compiler_params=pltpu.CompilerParams(
            dimension_semantics=("parallel",),
        ),
    )(x, w_pad, b_pad, mask)

    # Tiny wrapper-side relayout (~N*48 B): back to [N, 3, 3] and [N, 3].
    R = out[:9, :N].T.reshape(N, 3, 3)
    t = out[9:12, :N].T
    return t, R


def _reference(node_features, weight, bias, update_mask):
    """Pure-JAX reference mirroring the PyTorch forward."""
    proj = node_features.astype(jnp.float32) @ weight.T.astype(jnp.float32) + bias
    rot, t = proj[:, :3], proj[:, 3:]
    if update_mask is not None:
        rot = update_mask[:, None] * rot
        t = update_mask[:, None] * t
    norm = jnp.sqrt(1.0 + jnp.sum(rot ** 2, axis=-1, keepdims=True))
    q = rot / norm
    a = (1.0 / norm)[:, 0]
    b, c, d = q[:, 0], q[:, 1], q[:, 2]
    R = jnp.stack(
        [
            a ** 2 + b ** 2 - c ** 2 - d ** 2, 2 * b * c - 2 * a * d, 2 * b * d + 2 * a * c,
            2 * b * c + 2 * a * d, a ** 2 - b ** 2 + c ** 2 - d ** 2, 2 * c * d - 2 * a * b,
            2 * b * d - 2 * a * c, 2 * c * d + 2 * a * b, a ** 2 - b ** 2 - c ** 2 + d ** 2,
        ],
        axis=-1,
    ).reshape(-1, 3, 3)
    return t, R


if __name__ == "__main__":
    key = jax.random.PRNGKey(0)

    # --- check 1: small shape with an update mask --------------------------
    N, node_dim = 8, 32
    k_x, k_w, k_b, k_m, key = jax.random.split(key, 5)
    node_features = jax.random.normal(k_x, (N, node_dim), dtype=jnp.float32)
    weight = jax.random.normal(k_w, (6, node_dim), dtype=jnp.float32) * 0.1   # torch Linear layout
    bias = jax.random.normal(k_b, (6,), dtype=jnp.float32) * 0.1
    update_mask = (jax.random.uniform(k_m, (N,)) > 0.3).astype(jnp.float32)

    t_vec, R = backbone_update(node_features, weight, bias, update_mask)
    jax.block_until_ready((t_vec, R))
    t_ref, R_ref = _reference(node_features, weight, bias, update_mask)
    np.testing.assert_allclose(np.asarray(t_vec), np.asarray(t_ref), atol=1e-4, rtol=1e-4)
    np.testing.assert_allclose(np.asarray(R), np.asarray(R_ref), atol=1e-4, rtol=1e-4)

    # --- check 2: non-tile-aligned N, no mask (exercises padding path) -----
    N2, node_dim2 = 300, 64
    k_x2, k_w2, k_b2, key = jax.random.split(key, 4)
    nf2 = jax.random.normal(k_x2, (N2, node_dim2), dtype=jnp.float32)
    w2 = jax.random.normal(k_w2, (6, node_dim2), dtype=jnp.float32) * 0.1
    b2 = jax.random.normal(k_b2, (6,), dtype=jnp.float32) * 0.1

    t2, R2 = backbone_update(nf2, w2, b2, None)
    jax.block_until_ready((t2, R2))
    t2_ref, R2_ref = _reference(nf2, w2, b2, None)
    np.testing.assert_allclose(np.asarray(t2), np.asarray(t2_ref), atol=1e-4, rtol=1e-4)
    np.testing.assert_allclose(np.asarray(R2), np.asarray(R2_ref), atol=1e-4, rtol=1e-4)

    print("KERNEL_OK")
</pallas_src>

<mosaic_0001>
module attributes {stable_mosaic.version = 11 : i64} {
  func.func @_backbone_update_kernel(%arg0: i32, %arg1: memref<128x32xf32, #tpu.memory_space<vmem>>, %arg2: memref<32x8xf32, #tpu.memory_space<vmem>>, %arg3: memref<8x1xf32, #tpu.memory_space<vmem>>, %arg4: memref<1x128xf32, #tpu.memory_space<vmem>>, %arg5: memref<12x128xf32, #tpu.memory_space<vmem>>) attributes {dimension_semantics = [#tpu.dimension_semantics<parallel>], iteration_bounds = array<i64: 1>, scalar_prefetch = 0 : i64, scratch_operands = 0 : i64, tpu.core_type = #tpu.core_type<tc>, window_params = [{transform_indices = @transform_0, window_bounds = array<i64: 128, 32>}, {pipeline_mode = #tpu.pipeline_mode<synchronous>, transform_indices = @transform_1, window_bounds = array<i64: 32, 8>}, {pipeline_mode = #tpu.pipeline_mode<synchronous>, transform_indices = @transform_2, window_bounds = array<i64: 8, 1>}, {transform_indices = @transform_3, window_bounds = array<i64: 1, 128>}, {transform_indices = @transform_4, window_bounds = array<i64: 12, 128>}]} {
    %c0 = arith.constant 0 : index
    %c0_0 = arith.constant 0 : index
    %0 = vector.load %arg1[%c0, %c0_0] : memref<128x32xf32, #tpu.memory_space<vmem>>, vector<128x32xf32>
    %c0_1 = arith.constant 0 : index
    %c0_2 = arith.constant 0 : index
    %1 = vector.load %arg2[%c0_1, %c0_2] : memref<32x8xf32, #tpu.memory_space<vmem>>, vector<32x8xf32>
    %cst = arith.constant dense<0.000000e+00> : vector<128x8xf32>
    %2 = tpu.matmul %0, %1, %cst {dimension_numbers = #tpu.dot_dimension_numbers<[1], [0], [0], [1], [0, 0, 1, 1], [], []>} : vector<128x32xf32>, vector<32x8xf32>, vector<128x8xf32> -> vector<128x8xf32>
    %3 = tpu.transpose %2, [1, 0] : vector<128x8xf32> -> vector<8x128xf32>
    %c0_3 = arith.constant 0 : index
    %c0_4 = arith.constant 0 : index
    %4 = vector.load %arg3[%c0_3, %c0_4] : memref<8x1xf32, #tpu.memory_space<vmem>>, vector<8x1xf32>
    %5 = vector.broadcast %4 : vector<8x1xf32> to vector<8x128xf32>
    %6 = arith.addf %3, %5 : vector<8x128xf32>
    %c0_5 = arith.constant 0 : index
    %c0_6 = arith.constant 0 : index
    %7 = vector.load %arg4[%c0_5, %c0_6] : memref<1x128xf32, #tpu.memory_space<vmem>>, vector<1x128xf32>
    %8 = vector.extract_strided_slice %6 {offsets = [0, 0], sizes = [1, 128], strides = [1, 1]} : vector<8x128xf32> to vector<1x128xf32>
    %9 = arith.mulf %8, %7 : vector<1x128xf32>
    %10 = vector.extract_strided_slice %6 {offsets = [1, 0], sizes = [1, 128], strides = [1, 1]} : vector<8x128xf32> to vector<1x128xf32>
    %11 = arith.mulf %10, %7 : vector<1x128xf32>
    %12 = vector.extract_strided_slice %6 {offsets = [2, 0], sizes = [1, 128], strides = [1, 1]} : vector<8x128xf32> to vector<1x128xf32>
    %13 = arith.mulf %12, %7 : vector<1x128xf32>
    %14 = vector.extract_strided_slice %6 {offsets = [3, 0], sizes = [1, 128], strides = [1, 1]} : vector<8x128xf32> to vector<1x128xf32>
    %15 = arith.mulf %14, %7 : vector<1x128xf32>
    %16 = vector.extract_strided_slice %6 {offsets = [4, 0], sizes = [1, 128], strides = [1, 1]} : vector<8x128xf32> to vector<1x128xf32>
    %17 = arith.mulf %16, %7 : vector<1x128xf32>
    %18 = vector.extract_strided_slice %6 {offsets = [5, 0], sizes = [1, 128], strides = [1, 1]} : vector<8x128xf32> to vector<1x128xf32>
    %19 = arith.mulf %18, %7 : vector<1x128xf32>
    %20 = arith.mulf %9, %9 : vector<1x128xf32>
    %cst_7 = arith.constant 1.000000e+00 : f32
    %21 = vector.broadcast %cst_7 : f32 to vector<1x128xf32>
    %22 = arith.addf %21, %20 : vector<1x128xf32>
    %23 = arith.mulf %11, %11 : vector<1x128xf32>
    %24 = arith.addf %22, %23 : vector<1x128xf32>
    %25 = arith.mulf %13, %13 : vector<1x128xf32>
    %26 = arith.addf %24, %25 : vector<1x128xf32>
    %27 = math.rsqrt %26 : vector<1x128xf32>
    %28 = arith.mulf %9, %27 : vector<1x128xf32>
    %29 = arith.mulf %11, %27 : vector<1x128xf32>
    %30 = arith.mulf %13, %27 : vector<1x128xf32>
    %31 = arith.mulf %27, %27 : vector<1x128xf32>
    %32 = arith.mulf %28, %28 : vector<1x128xf32>
    %33 = arith.mulf %29, %29 : vector<1x128xf32>
    %34 = arith.mulf %30, %30 : vector<1x128xf32>
    %35 = arith.addf %31, %32 : vector<1x128xf32>
    %36 = arith.subf %35, %33 : vector<1x128xf32>
    %37 = arith.subf %36, %34 : vector<1x128xf32>
    %38 = arith.mulf %28, %29 : vector<1x128xf32>
    %39 = arith.mulf %27, %30 : vector<1x128xf32>
    %40 = arith.subf %38, %39 : vector<1x128xf32>
    %cst_8 = arith.constant 2.000000e+00 : f32
    %41 = vector.broadcast %cst_8 : f32 to vector<1x128xf32>
    %42 = arith.mulf %41, %40 : vector<1x128xf32>
    %43 = arith.mulf %28, %30 : vector<1x128xf32>
    %44 = arith.mulf %27, %29 : vector<1x128xf32>
    %45 = arith.addf %43, %44 : vector<1x128xf32>
    %cst_9 = arith.constant 2.000000e+00 : f32
    %46 = vector.broadcast %cst_9 : f32 to vector<1x128xf32>
    %47 = arith.mulf %46, %45 : vector<1x128xf32>
    %48 = arith.mulf %28, %29 : vector<1x128xf32>
    %49 = arith.mulf %27, %30 : vector<1x128xf32>
    %50 = arith.addf %48, %49 : vector<1x128xf32>
    %cst_10 = arith.constant 2.000000e+00 : f32
    %51 = vector.broadcast %cst_10 : f32 to vector<1x128xf32>
    %52 = arith.mulf %51, %50 : vector<1x128xf32>
    %53 = arith.subf %31, %32 : vector<1x128xf32>
    %54 = arith.addf %53, %33 : vector<1x128xf32>
    %55 = arith.subf %54, %34 : vector<1x128xf32>
    %56 = arith.mulf %29, %30 : vector<1x128xf32>
    %57 = arith.mulf %27, %28 : vector<1x128xf32>
    %58 = arith.subf %56, %57 : vector<1x128xf32>
    %cst_11 = arith.constant 2.000000e+00 : f32
    %59 = vector.broadcast %cst_11 : f32 to vector<1x128xf32>
    %60 = arith.mulf %59, %58 : vector<1x128xf32>
    %61 = arith.mulf %28, %30 : vector<1x128xf32>
    %62 = arith.mulf %27, %29 : vector<1x128xf32>
    %63 = arith.subf %61, %62 : vector<1x128xf32>
    %cst_12 = arith.constant 2.000000e+00 : f32
    %64 = vector.broadcast %cst_12 : f32 to vector<1x128xf32>
    %65 = arith.mulf %64, %63 : vector<1x128xf32>
    %66 = arith.mulf %29, %30 : vector<1x128xf32>
    %67 = arith.mulf %27, %28 : vector<1x128xf32>
    %68 = arith.addf %66, %67 : vector<1x128xf32>
    %cst_13 = arith.constant 2.000000e+00 : f32
    %69 = vector.broadcast %cst_13 : f32 to vector<1x128xf32>
    %70 = arith.mulf %69, %68 : vector<1x128xf32>
    %71 = arith.subf %31, %32 : vector<1x128xf32>
    %72 = arith.subf %71, %33 : vector<1x128xf32>
    %73 = arith.addf %72, %34 : vector<1x128xf32>
    %74 = tpu.concatenate %37, %42, %47, %52, %55, %60, %65, %70, %73, %15, %17, %19 in 0 : vector<1x128xf32>, vector<1x128xf32>, vector<1x128xf32>, vector<1x128xf32>, vector<1x128xf32>, vector<1x128xf32>, vector<1x128xf32>, vector<1x128xf32>, vector<1x128xf32>, vector<1x128xf32>, vector<1x128xf32>, vector<1x128xf32> -> vector<12x128xf32>
    %c0_14 = arith.constant 0 : index
    %c0_15 = arith.constant 0 : index
    %75 = vector.load %arg5[%c0_14, %c0_15] : memref<12x128xf32, #tpu.memory_space<vmem>>, vector<12x128xf32>
    tpu.vector_store %arg5[%c0_14, %c0_15], %74 {strides = array<i32>} : memref<12x128xf32, #tpu.memory_space<vmem>>, vector<12x128xf32>,
    return
  }
  func.func @transform_0(%arg0: i32) -> (i32, i32) {
    %c0_i32 = arith.constant 0 : i32
    %c0_i32_0 = arith.constant 0 : i32
    return %arg0, %c0_i32 : i32, i32
  }
  func.func @transform_1(%arg0: i32) -> (i32, i32) {
    %c0_i32 = arith.constant 0 : i32
    %c0_i32_0 = arith.constant 0 : i32
    %c0_i32_1 = arith.constant 0 : i32
    return %c0_i32, %c0_i32_0 : i32, i32
  }
  func.func @transform_2(%arg0: i32) -> (i32, i32) {
    %c0_i32 = arith.constant 0 : i32
    %c0_i32_0 = arith.constant 0 : i32
    %c0_i32_1 = arith.constant 0 : i32
    return %c0_i32, %c0_i32_0 : i32, i32
  }
  func.func @transform_3(%arg0: i32) -> (i32, i32) {
    %c0_i32 = arith.constant 0 : i32
    %c0_i32_0 = arith.constant 0 : i32
    return %c0_i32, %arg0 : i32, i32
  }
  func.func @transform_4(%arg0: i32) -> (i32, i32) {
    %c0_i32 = arith.constant 0 : i32
    %c0_i32_0 = arith.constant 0 : i32
    return %c0_i32, %arg0 : i32, i32
  }
}

</mosaic_0001>

<bundles_post_ra>
// kernel: tpu_custom_call.1
= control target key start
LH: loop header
LB: loop body
LE: loop exit
PB: predicated region body
PF: predicated region fallthrough
CT: control target
= control target key end

     0   :  { %vm38_vm0 = vcmask 261120   ;;  %v516_v6 = vmov 0   ;;  %s646_s0 = inlined_call_operand.vmem [shape: f32[128,32], index: 0, kind: input, shape index: {}]   ;;  %s647_s1 = inlined_call_operand.vmem [shape: f32[32,8], index: 1, kind: input, shape index: {}]   ;;  %s648_s2 = inlined_call_operand.vmem [shape: f32[8,1], index: 2, kind: input, shape index: {}]   ;;  %s649_s3 = inlined_call_operand.vmem [shape: f32[1,128], index: 3, kind: input, shape index: {}]   ;;  %s650_s4 = inlined_call_operand.hbm [shape: f32[12,128], index: 4, kind: output, shape index: {}]  }
   0x1   :  { %v34_v0 = vld [vmem:[%s647_s1] sm:$0xff]  ;;  %v35_v1 = vld [vmem:[%s647_s1 + $0x8] sm:$0xff]  ;;  %v36_v2 = vld [vmem:[%s647_s1 + $0x10] sm:$0xff]  ;;  %489 = vset.pattern.permute.xlu0 %v516_v6 }
   0x2   :  { %v473_v3 = vpack.c.bf16 %v35_v1, %v34_v0  ;;  %v37_v4 = vld [vmem:[%s647_s1 + $0x18] sm:$0xff]  ;;  %v18_v5 = vld [vmem:[%s646_s0] sm:$0xff] }
   0x3   :  { %v477_v7 = vpack.c.bf16 %v37_v4, %v36_v2  ;;  %449 = vmatprep.mubr.msk.f32.mxu0 %vm38_vm0, %v18_v5  ;;  %v26_v8 = vld [vmem:[%s646_s0 + $0x40] sm:$0xff] }
   0x4   :  { %474 = vmatprep.subr.bf16.mxu0 %v473_v3  ;;  %481 = vmatprep.subr.bf16.mxu1 %v473_v3  ;;  %v264_v9 = vld [vmem:[%s648_s2] sm:$0xff] }
   0x5   :  { %476 = vmatpush3.bf16.msra.mxu0 %v473_v3  ;;  %483 = vmatpush3.bf16.msra.mxu1 %v473_v3 }
   0x6   :  { %478 = vmatprep.subr.bf16.mxu0 %v477_v7  ;;  %482 = vmatprep.subr.bf16.mxu1 %v477_v7 }
   0x7   :  { %461 = vmatprep.mubr.msk.f32.mxu1 %vm38_vm0, %v26_v8  ;;  %267 = vperm.xlu0 %489, %v264_v9  }
   0x8   :  { %9 = vsyncpa [#allocation3], 0  ;;  %v19_v10 = vld [vmem:[%s646_s0 + $0x8] sm:$0xff]  ;;  %v20_v12 = vld [vmem:[%s646_s0 + $0x10] sm:$0xff]  ;;  %v274_v40 = vlaneseq  ;;  %vm370_vm1 = vcmask 1040384   ;;  %vm372_vm2 = vcmask 1041408  }
   0x9   :  { %480 = vmatpush3.bf16.msra.mxu0 %v477_v7  ;;  %484 = vmatpush3.bf16.msra.mxu1 %v477_v7  ;;  %v27_v11 = vld [vmem:[%s646_s0 + $0x48] sm:$0xff]  ;;  %v28_v13 = vld [vmem:[%s646_s0 + $0x50] sm:$0xff]  ;;  %v21_v14 = vld [vmem:[%s646_s0 + $0x18] sm:$0xff]  ;;  %vm374_vm3 = vcmask 1042432   ;;  %vm376_vm4 = vcmask 1043456   ;;  %vm378_vm5 = vcmask 1044480  }
   0xa   :  { %v29_v15 = vld [vmem:[%s646_s0 + $0x58] sm:$0xff]  ;;  %v22_v16 = vld [vmem:[%s646_s0 + $0x20] sm:$0xff]  ;;  %v23_v18 = vld [vmem:[%s646_s0 + $0x28] sm:$0xff]  ;;  %v275_v41 = vshrl.u32 %v274_v40, 7  ;;  %vm380_vm6 = vcmask 1045504   ;;  %vm382_vm7 = vcmask 1046528  }
   0xb   :  { %v30_v17 = vld [vmem:[%s646_s0 + $0x60] sm:$0xff]  ;;  %v31_v19 = vld [vmem:[%s646_s0 + $0x68] sm:$0xff]  ;;  %v24_v20 = vld [vmem:[%s646_s0 + $0x30] sm:$0xff] }
   0xc   :  { %450 = vmatmul.mubr.msk.f32.vlgmr.msra.gmra.mrb[0].mxu0 %vm38_vm0, %v19_v10  ;;  %462 = vmatmul.mubr.msk.f32.vlgmr.msra.gmra.mrb[0].mxu1 %vm38_vm0, %v27_v11  ;;  %v32_v21 = vld [vmem:[%s646_s0 + $0x70] sm:$0xff]  ;;  %v25_v22 = vld [vmem:[%s646_s0 + $0x38] sm:$0xff]  ;;  %v276_v42 = vsub.s32 0, %v275_v41  ;;  %v271_v44 = vld [vmem:[%s649_s3] sm:$0x1]  ;;  %s517_s3 = smov [#allocation2]  }
   0xd   :  { %452 = vmatprep.mubr.msk.f32.mxu0 %vm38_vm0, %v20_v12  ;;  %464 = vmatprep.mubr.msk.f32.mxu1 %vm38_vm0, %v28_v13  ;;  %v33_v23 = vld [vmem:[%s646_s0 + $0x78] sm:$0xff]  ;;  %s394_s29 = sshll.u32 %s517_s3, 4  ;;  %s395_s29 = int_to_ptr.vmem [resolvable:$true] %s394_s29 }
   0xe   :  { %v277_v45 = vrot.slane %v271_v44, %v276_v42  ;;  %s492_s30 = scalar_lea.vmem %s395_s29, 256  ;;  %p497_p1 = scmp.lt.s32.totalorder %s395_s29, %s395_s29 }
   0xf   :  { %p493_p0 = scmp.ne.s32.totalorder %s395_s29, %s492_s30  ;;  %p498_p2 = scmp.lt.s32.totalorder %s492_s30, %s492_s30 }
  0x10   :  { %453 = vmatmul.mubr.msk.f32.gmra.mrb[2].mxu0 %vm38_vm0, %v21_v14  ;;  %465 = vmatmul.mubr.msk.f32.gmra.mrb[2].mxu1 %vm38_vm0, %v29_v15 }
  0x11   :  { %455 = vmatprep.mubr.msk.f32.mxu0 %vm38_vm0, %v22_v16  ;;  %467 = vmatprep.mubr.msk.f32.mxu1 %vm38_vm0, %v30_v17  ;;  %p499_p3 = por %p498_p2, %p497_p1 }
  0x13   :  { %p500_p4 = pnand %p499_p3, %p493_p0 }
  0x14   :  { %456 = vmatmul.mubr.msk.f32.gmra.mrb[4].mxu0 %vm38_vm0, %v23_v18  ;;  %468 = vmatmul.mubr.msk.f32.gmra.mrb[4].mxu1 %vm38_vm0, %v31_v19 }
  0x15   :  { %458 = vmatprep.mubr.msk.f32.mxu0 %vm38_vm0, %v24_v20  ;;  %470 = vmatprep.mubr.msk.f32.mxu1 %vm38_vm0, %v32_v21 }
  0x18   :  { %459 = vmatmul.mubr.msk.f32.gmra.mrb[6].mxu0 %vm38_vm0, %v25_v22  ;;  %471 = vmatmul.mubr.msk.f32.gmra.mrb[6].mxu1 %vm38_vm0, %v33_v23 }
  0x86   :  { %v268_v43 = vpop.permute.xlu0 %267 }
  0xdf   :  { %v451_v24 = vpop.f32.mrb[0].mxu0  ;;  %v463_v25 = vpop.f32.mrb[0].mxu1 }
  0xe0   :  { %v153_v26 = vpop.f32.mrb[1].mxu0  ;;  %v193_v27 = vpop.f32.mrb[1].mxu1 }
  0xe1   :  { %232 = vxpose.xlu0.b32.start [1/16] (narrow) %v153_v26, 8 }
  0xe3   :  { %v454_v28 = vpop.f32.mrb[2].mxu0  ;;  %v466_v29 = vpop.f32.mrb[2].mxu1 }
  0xe4   :  { %v163_v30 = vpop.f32.mrb[3].mxu0  ;;  %v203_v31 = vpop.f32.mrb[3].mxu1 }
  0xe5   :  { %233 = vxpose.xlu0.b32.cont [2/16] (narrow) %v451_v24, 8 }
  0xe7   :  { %v457_v32 = vpop.f32.mrb[4].mxu0  ;;  %v469_v33 = vpop.f32.mrb[4].mxu1 }
  0xe8   :  { %v173_v34 = vpop.f32.mrb[5].mxu0  ;;  %v213_v35 = vpop.f32.mrb[5].mxu1 }
  0xe9   :  { %234 = vxpose.xlu0.b32.cont [3/16] (narrow) %v163_v30, 8 }
  0xeb   :  { %v460_v36 = vpop.f32.mrb[6].mxu0  ;;  %v472_v37 = vpop.f32.mrb[6].mxu1 }
  0xec   :  { %v183_v38 = vpop.f32.mrb[7].mxu0  ;;  %v223_v39 = vpop.f32.mrb[7].mxu1 }
  0xed   :  { %235 = vxpose.xlu0.b32.cont [4/16] (narrow) %v454_v28, 8 }
  0xf1   :  { %236 = vxpose.xlu0.b32.cont [5/16] (narrow) %v173_v34, 8 }
  0xf5   :  { %237 = vxpose.xlu0.b32.cont [6/16] (narrow) %v457_v32, 8 }
  0xf9   :  { %238 = vxpose.xlu0.b32.cont [7/16] (narrow) %v183_v38, 8 }
  0xfd   :  { %239 = vxpose.xlu0.b32.cont [8/16] (narrow) %v460_v36, 8 }
 0x101   :  { %240 = vxpose.xlu0.b32.cont [9/16] (narrow) %v193_v27, 8 }
 0x105   :  { %241 = vxpose.xlu0.b32.cont [10/16] (narrow) %v463_v25, 8 }
 0x109   :  { %242 = vxpose.xlu0.b32.cont [11/16] (narrow) %v203_v31, 8 }
 0x10d   :  { %243 = vxpose.xlu0.b32.cont [12/16] (narrow) %v466_v29, 8 }
 0x111   :  { %244 = vxpose.xlu0.b32.cont [13/16] (narrow) %v213_v35, 8 }
 0x115   :  { %245 = vxpose.xlu0.b32.cont [14/16] (narrow) %v469_v33, 8 }
 0x119   :  { %246 = vxpose.xlu0.b32.cont [15/16] (narrow) %v223_v39, 8 }
 0x11d   :  { %247 = vxpose.xlu0.b32.end [16/16] (narrow) %v472_v37, 8 }
 0x161   :  { %v248_v46 = vpop.trf.xlu0 }
 0x162   :  { %v270_v47 = vadd.f32 %v268_v43, %v248_v46 }
 0x164   :  { %v272_v48 = vmul.f32 %v271_v44, %v270_v47  ;;  %v279_v49 = vmul.f32 %v277_v45, %v270_v47 }
 0x166   :  { %v280_v50 = vmul.f32 %v272_v48, %v272_v48  ;;  %v282_v51 = vmul.f32 %v279_v49, %v279_v49  ;;  %v368_v30 = vrot.slane %v279_v49, 2 }
 0x168   :  { %v281_v52 = vadd.f32 1.0, %v280_v50  ;;  %v284_v53 = vrot.slane %v282_v51, 1  ;;  %v287_v55 = vrot.slane %v282_v51, 2 }
 0x16a   :  { %v286_v54 = vadd.f32 %v284_v53, %v281_v52 }
 0x16c   :  { %v289_v56 = vadd.f32 %v287_v55, %v286_v54 }
 0x16e   :  { %490 = vrsqrt.f32 %v289_v56 }
 0x178   :  { %v491_v57 = vpop.eup %490 }
 0x179   :  { %v291_v58 = vmul.f32 %v491_v57, %v272_v48  ;;  %v293_v59 = vrot.slane %v491_v57, 7  ;;  %v296_v60 = vrot.slane %v491_v57, 6  ;;  %v299_v0 = vmul.f32 %v491_v57, %v491_v57 }
 0x17b   :  { %v295_v61 = vmul.f32 %v293_v59, %v279_v49  ;;  %v298_v62 = vmul.f32 %v296_v60, %v279_v49  ;;  %v300_v63 = vmul.f32 %v291_v58, %v291_v58  ;;  %v334_v1 = vmul.f32 %v491_v57, %v291_v58 }
 0x17d   :  { %v301_v2 = vmul.f32 %v295_v61, %v295_v61  ;;  %v313_v3 = vrot.slane %v295_v61, 1  ;;  %v302_v4 = vmul.f32 %v298_v62, %v298_v62  ;;  %v303_v5 = vadd.f32 %v300_v63, %v299_v0 }
 0x17e   :  { %v317_v6 = vrot.slane %v298_v62, 2  ;;  %v331_v7 = vrot.slane %v298_v62, 1  ;;  %v328_v11 = vsub.f32 %v299_v0, %v300_v63  ;;  %v336_v15 = vrot.slane %v334_v1, 7 }
 0x17f   :  { %v305_v8 = vrot.slane %v301_v2, 1  ;;  %v315_v9 = vmul.f32 %v313_v3, %v291_v58  ;;  %v323_v10 = vmul.f32 %v491_v57, %v313_v3  ;;  %v309_v23 = vrot.slane %v302_v4, 2 }
 0x180   :  { %v319_v12 = vmul.f32 %v491_v57, %v317_v6  ;;  %v322_v13 = vmul.f32 %v317_v6, %v291_v58  ;;  %v333_v14 = vmul.f32 %v331_v7, %v295_v61 }
 0x181   :  { %v307_v16 = vsub.f32 %v303_v5, %v305_v8  ;;  %v329_v17 = vadd.f32 %v328_v11, %v305_v8  ;;  %v344_v18 = vsub.f32 %v328_v11, %v305_v8 }
 0x182   :  { %v320_v19 = vsub.f32 %v315_v9, %v319_v12  ;;  %v324_v20 = vadd.f32 %v323_v10, %v322_v13  ;;  %v326_v21 = vadd.f32 %v319_v12, %v315_v9  ;;  %v338_v22 = vsub.f32 %v333_v14, %v336_v15 }
 0x183   :  { %v340_v24 = vsub.f32 %v322_v13, %v323_v10  ;;  %v342_v28 = vadd.f32 %v336_v15, %v333_v14  ;;  %v330_v29 = vsub.f32 %v329_v17, %v309_v23  ;;  %v345_v31 = vadd.f32 %v344_v18, %v309_v23 }
 0x184   :  { %v321_v25 = vmul.f32 2.0, %v320_v19  ;;  %v325_v26 = vmul.f32 2.0, %v324_v20  ;;  %v327_v27 = vmul.f32 2.0, %v326_v21  ;;  %v311_v32 = vsub.f32 %v307_v16, %v309_v23 }
 0x185   :  { %v339_v33 = vmul.f32 2.0, %v338_v22  ;;  %v341_v36 = vmul.f32 2.0, %v340_v24  ;;  %v384_v37 = vsel %vm370_vm1, %v345_v31, %v368_v30  ;;  %v343_v39 = vmul.f32 2.0, %v342_v28 }
 0x186   :  { %v347_v34 = vrot.slane %v321_v25, 7  ;;  %v350_v35 = vrot.slane %v325_v26, 6  ;;  %v353_v38 = vrot.slane %v327_v27, 5  ;;  %v385_v41 = vsel %vm372_vm2, %v384_v37, %v368_v30 }
 0x187   :  { %v356_v42 = vrot.slane %v330_v29, 4  ;;  %v386_v44 = vsel %vm374_vm3, %v385_v41, %v368_v30  ;;  %v359_v45 = vrot.slane %v339_v33, 4  ;;  %v362_v47 = vrot.slane %v341_v36, 2 }
 0x188   :  { %v371_v40 = vsel %vm370_vm1, %v311_v32, %v347_v34  ;;  %388 = vst [vmem:[#allocation2 + $0x8] sm:$0xf] %v386_v44  ;;  %v365_v49 = vrot.slane %v343_v39, 2 }
 0x189   :  { %v373_v43 = vsel %vm372_vm2, %v371_v40, %v350_v35 }
 0x18a   :  { %v375_v46 = vsel %vm374_vm3, %v373_v43, %v353_v38 }
 0x18b   :  { %v377_v48 = vsel %vm376_vm4, %v375_v46, %v356_v42 }
 0x18c   :  { %v379_v50 = vsel %vm378_vm5, %v377_v48, %v359_v45 }
 0x18d   :  { %v381_v51 = vsel %vm380_vm6, %v379_v50, %v362_v47 }
 0x18e   :  { %v383_v52 = vsel %vm382_vm7, %v381_v51, %v365_v49 }
 0x18f   :  { %387 = vst [vmem:[#allocation2] sm:$0xff] %v383_v52 }
 0x190   :  { %503 = shalt.err (!%p500_p4)
}
 0x191   :  { %s504_s7 = scalar_lea.hbm %s650_s4, 256 }
 0x192   :  { %p505_p5 = scmp.ne.s32.totalorder %s650_s4, %s504_s7  ;;  %p508_p6 = scmp.lt.u32.totalorder %s504_s7, %s650_s4 }
 0x194   :  { %p510_p7 = pnand %p508_p6, %p505_p5 }
 0x196   :  { %513 = shalt.err (!%p510_p7)
}
 0x197   :  { %s518_s11 = smov 128   ;;  %s519_s12 = smov 8  }
 0x198   :  { %400 = dma.vmem_to_hbm [thread:$0]  %s395_s29, 256, %s650_s4, [#allocation3], %s518_s11, %s518_s11, %s519_s12  }
 0x199   :  { %514 = dma.done.wait [#allocation3], 256  }
 0x19a   :  { %515 = vsyncadd [#allocation3], 4294967040 }
 0x19b   :  { %404 = vsyncpa [#allocation3], 1 }

</bundles_post_ra>
